<compile_context>
chip_gen: v6e
topology: v6e:2x2x1
jax: 0.10.0
libtpu: 0.0.40
codegen_flags: <defaults>
</compile_context>

<pallas_src>
import math
from functools import partial

import jax
import jax.numpy as jnp
from jax import lax
from jax.experimental import pallas as pl
from jax.experimental.pallas import tpu as pltpu


def _gelu_exact(x):
    # matches torch.nn.GELU() default (erf-based)
    return 0.5 * x * (1.0 + lax.erf(x * (1.0 / math.sqrt(2.0))))


def mlp_kernel(*refs, W, R, use_halo):
    # refs (use_halo=True):  xm, xt, xb, w1t, b1, dw9, db, w2t, b2, out
    # refs (use_halo=False): xm,          w1t, b1, dw9, db, w2t, b2, out
    if use_halo:
        (xm_ref, xt_ref, xb_ref, w1_ref, b1_ref, dw_ref, db_ref,
         w2_ref, b2_ref, o_ref) = refs
    else:
        (xm_ref, w1_ref, b1_ref, dw_ref, db_ref,
         w2_ref, b2_ref, o_ref) = refs

    Cin = xm_ref.shape[1]
    RW = R * W                 # spatial positions produced by this step
    E = (R + 2) * W            # with one halo row of context on each side

    xm = xm_ref[0]                                   # (Cin, R*W)
    if use_halo:
        xt = xt_ref[0][:, 128 - W:]                  # row above the tile (Cin, W)
        xb = xb_ref[0][:, :W]                        # row below the tile (Cin, W)
    else:
        xt = jnp.zeros((Cin, W), dtype=xm.dtype)
        xb = jnp.zeros((Cin, W), dtype=xm.dtype)

    # extended input: [halo row | R rows | halo row] flattened on the lane axis
    xe = jnp.concatenate([xt, xm, xb], axis=-1)      # (Cin, E)

    # fc1 (1x1 conv) == (Ch, Cin) @ (Cin, E) on the MXU, f32 accumulation
    he = jnp.dot(w1_ref[...], xe, preferred_element_type=jnp.float32)
    he = he + b1_ref[...]                            # (Ch, 1) lane-broadcast

    # zero the halo rows that fall outside the image (conv zero padding acts on
    # the fc1 *output*, which includes the bias, so mask after fc1)
    i = pl.program_id(1)
    last = pl.num_programs(1) - 1
    pos = lax.broadcasted_iota(jnp.int32, (1, E), 1)
    valid = jnp.logical_and(jnp.logical_or(pos >= W, i > 0),
                            jnp.logical_or(pos < E - W, i < last))
    he = jnp.where(valid, he, 0.0)

    # +/-1 lane shifts (left/right neighbours), zero-filled at the two ends
    zcol = jnp.zeros((he.shape[0], 1), dtype=he.dtype)
    hpad = jnp.concatenate([zcol, he, zcol], axis=-1)    # (Ch, E+2)
    c_m = hpad[:, 0:E]                                   # value[q] = he[q-1]
    c_p = hpad[:, 2:E + 2]                               # value[q] = he[q+1]

    # image-column edge masks (left/right zero padding of the 3x3 conv)
    col = pos % W
    c_m = jnp.where(col > 0, c_m, 0.0)
    c_p = jnp.where(col < W - 1, c_p, 0.0)

    # depthwise 3x3: per row-tap dy, combine the three column-taps, then shift
    # by whole image rows (static lane-offset slices of the extended tile)
    dw = dw_ref[...]                                     # (Ch, 9)
    acc = None
    for dy in range(3):
        g = (dw[:, 3 * dy + 0:3 * dy + 1] * c_m
             + dw[:, 3 * dy + 1:3 * dy + 2] * he
             + dw[:, 3 * dy + 2:3 * dy + 3] * c_p)       # (Ch, E)
        part = g[:, dy * W:dy * W + RW]                  # (Ch, R*W)
        acc = part if acc is None else acc + part
    acc = acc + db_ref[...]                              # (Ch, 1)

    a = _gelu_exact(acc)                                 # (Ch, R*W) f32

    # fc2 (1x1 conv) == (Cout, Ch) @ (Ch, R*W); output is lane-dense
    out = jnp.dot(w2_ref[...], a, preferred_element_type=jnp.float32)
    out = out + b2_ref[...]                              # (Cout, 1)
    o_ref[0] = out.astype(o_ref.dtype)


def _pick_row_tile(H, W, Cin, Ch, Cout, budget_bytes=12 * 1024 * 1024):
    """Largest row-tile R (divisor of H, R*W % 128 == 0) fitting the VMEM budget."""
    def fits(r):
        e = (r + 2) * W
        est = 4 * (Cin * e + 5 * Ch * e + 2 * Ch * r * W + 2 * Cout * r * W) * 2
        return est <= budget_bytes

    if W <= 128:
        cands = [r for r in range(1, H)
                 if H % r == 0 and (r * W) % 128 == 0 and fits(r)]
        if cands:
            return max(cands), True
    return H, False   # fall back to whole image per grid step (halo rows are zero)


def mlp_forward(x_nchw, params):
    B, Cin, H, W = x_nchw.shape
    Ch = params["w1"].shape[1]
    Cout = params["w2"].shape[1]
    HW = H * W

    # free reshape (no HBM transpose): NCHW -> (B, C, H*W)
    x = x_nchw.reshape(B, Cin, HW)

    # weights/biases in kernel layout (tiny one-time host-side ops)
    w1t = params["w1"].T                    # (Ch, Cin)
    w2t = params["w2"].T                    # (Cout, Ch)
    dwk = params["dw"].reshape(9, Ch).T     # (Ch, 9), col k = tap (dy, dx), k=3*dy+dx
    b1c = params["b1"].reshape(Ch, 1)
    dbc = params["db"].reshape(Ch, 1)
    b2c = params["b2"].reshape(Cout, 1)

    R, use_halo = _pick_row_tile(H, W, Cin, Ch, Cout)
    nT = H // R
    RW = R * W

    in_arrays = [x]
    in_specs = [pl.BlockSpec((1, Cin, RW), lambda b, i: (b, 0, i))]
    if use_halo:
        CPB = RW // 128          # 128-lane chunks per row tile
        NCHUNK = HW // 128
        in_arrays += [x, x]
        in_specs += [
            # chunk whose last W lanes are the image row just above the tile
            pl.BlockSpec((1, Cin, 128),
                         lambda b, i: (b, 0, jnp.maximum(i * CPB - 1, 0))),
            # chunk whose first W lanes are the image row just below the tile
            pl.BlockSpec((1, Cin, 128),
                         lambda b, i: (b, 0, jnp.minimum((i + 1) * CPB, NCHUNK - 1))),
        ]
    in_arrays += [w1t, b1c, dwk, dbc, w2t, b2c]
    in_specs += [
        pl.BlockSpec((Ch, Cin), lambda b, i: (0, 0)),
        pl.BlockSpec((Ch, 1), lambda b, i: (0, 0)),
        pl.BlockSpec((Ch, 9), lambda b, i: (0, 0)),
        pl.BlockSpec((Ch, 1), lambda b, i: (0, 0)),
        pl.BlockSpec((Cout, Ch), lambda b, i: (0, 0)),
        pl.BlockSpec((Cout, 1), lambda b, i: (0, 0)),
    ]

    cost = pl.CostEstimate(
        flops=2 * B * HW * Ch * (Cin + Cout + 9),
        transcendentals=B * HW * Ch,
        bytes_accessed=4 * (B * Cin * HW + B * Cout * HW
                            + Ch * (Cin + Cout + 11) + Cout),
    )

    out = pl.pallas_call(
        partial(mlp_kernel, W=W, R=R, use_halo=use_halo),
        out_shape=jax.ShapeDtypeStruct((B, Cout, HW), x.dtype),
        grid=(B, nT),
        in_specs=in_specs,
        out_specs=pl.BlockSpec((1, Cout, RW), lambda b, i: (b, 0, i)),
        compiler_params=pltpu.CompilerParams(
            dimension_semantics=("parallel", "parallel"),
            vmem_limit_bytes=64 * 1024 * 1024),
        cost_estimate=cost,
    )(*in_arrays)

    # free reshape back to NCHW
    return out.reshape(B, Cout, H, W)


def init_params(key, in_features, hidden_features, out_features):
    k1, k2, k3 = jax.random.split(key, 3)
    # PyTorch Conv2d init in Mlp._init_weights: N(0, sqrt(2/fan_out)), bias = 0
    fan_fc1 = 1 * 1 * hidden_features
    fan_dw = (3 * 3 * hidden_features) // hidden_features   # groups = hidden
    fan_fc2 = 1 * 1 * out_features
    return {
        "w1": jax.random.normal(k1, (in_features, hidden_features), jnp.float32)
              * math.sqrt(2.0 / fan_fc1),
        "b1": jnp.zeros((1, hidden_features), jnp.float32),
        "dw": jax.random.normal(k2, (3, 3, hidden_features), jnp.float32)
              * math.sqrt(2.0 / fan_dw),
        "db": jnp.zeros((1, hidden_features), jnp.float32),
        "w2": jax.random.normal(k3, (hidden_features, out_features), jnp.float32)
              * math.sqrt(2.0 / fan_fc2),
        "b2": jnp.zeros((1, out_features), jnp.float32),
    }


def mlp_reference(x_nchw, params):
    """Pure-JAX reference mirroring the PyTorch forward (NCHW)."""
    w1 = params["w1"]  # (Cin, Ch)
    w2 = params["w2"]  # (Ch, Cout)
    dw = params["dw"]  # (3, 3, Ch)
    h = jnp.einsum("bchw,cd->bdhw", x_nchw, w1) + params["b1"][0][None, :, None, None]
    Ch = w1.shape[1]
    dw_oihw = jnp.transpose(dw, (2, 0, 1))[:, None, :, :]  # (Ch,1,3,3)
    h = lax.conv_general_dilated(
        h, dw_oihw, window_strides=(1, 1), padding=((1, 1), (1, 1)),
        dimension_numbers=("NCHW", "OIHW", "NCHW"), feature_group_count=Ch)
    h = h + params["db"][0][None, :, None, None]
    h = _gelu_exact(h)
    out = jnp.einsum("bchw,cd->bdhw", h, w2) + params["b2"][0][None, :, None, None]
    return out


if __name__ == "__main__":
    B, Cin, H, W = 2, 4, 16, 16
    hidden = 32
    Cout = Cin  # out_features defaults to in_features

    key = jax.random.PRNGKey(0)
    kx, kp = jax.random.split(key)
    x = jax.random.normal(kx, (B, Cin, H, W), jnp.float32)
    params = init_params(kp, Cin, hidden, Cout)

    out = jax.block_until_ready(mlp_forward(x, params))
    ref = jax.block_until_ready(mlp_reference(x, params))

    assert out.shape == (B, Cout, H, W)
    assert jnp.max(jnp.abs(out - ref)) < 1e-3, "mismatch vs. pure-JAX reference"

    print("KERNEL_OK")
</pallas_src>

<mosaic_0001>
module attributes {stable_mosaic.version = 11 : i64} {
  func.func @mlp_kernel(%arg0: i32, %arg1: i32, %arg2: memref<1x4x128xf32, #tpu.memory_space<vmem>>, %arg3: memref<1x4x128xf32, #tpu.memory_space<vmem>>, %arg4: memref<1x4x128xf32, #tpu.memory_space<vmem>>, %arg5: memref<32x4xf32, #tpu.memory_space<vmem>>, %arg6: memref<32x1xf32, #tpu.memory_space<vmem>>, %arg7: memref<32x9xf32, #tpu.memory_space<vmem>>, %arg8: memref<32x1xf32, #tpu.memory_space<vmem>>, %arg9: memref<4x32xf32, #tpu.memory_space<vmem>>, %arg10: memref<4x1xf32, #tpu.memory_space<vmem>>, %arg11: memref<1x4x128xf32, #tpu.memory_space<vmem>>) attributes {dimension_semantics = [#tpu.dimension_semantics<parallel>, #tpu.dimension_semantics<parallel>], iteration_bounds = array<i64: 2, 2>, scalar_prefetch = 0 : i64, scratch_operands = 0 : i64, tpu.core_type = #tpu.core_type<tc>, window_params = [{transform_indices = @transform_0, window_bounds = array<i64: 1, 4, 128>}, {transform_indices = @transform_1, window_bounds = array<i64: 1, 4, 128>}, {transform_indices = @transform_2, window_bounds = array<i64: 1, 4, 128>}, {pipeline_mode = #tpu.pipeline_mode<synchronous>, transform_indices = @transform_3, window_bounds = array<i64: 32, 4>}, {pipeline_mode = #tpu.pipeline_mode<synchronous>, transform_indices = @transform_4, window_bounds = array<i64: 32, 1>}, {pipeline_mode = #tpu.pipeline_mode<synchronous>, transform_indices = @transform_5, window_bounds = array<i64: 32, 9>}, {pipeline_mode = #tpu.pipeline_mode<synchronous>, transform_indices = @transform_6, window_bounds = array<i64: 32, 1>}, {pipeline_mode = #tpu.pipeline_mode<synchronous>, transform_indices = @transform_7, window_bounds = array<i64: 4, 32>}, {pipeline_mode = #tpu.pipeline_mode<synchronous>, transform_indices = @transform_8, window_bounds = array<i64: 4, 1>}, {transform_indices = @transform_9, window_bounds = array<i64: 1, 4, 128>}]} {
    %c0 = arith.constant 0 : index
    %c0_0 = arith.constant 0 : index
    %c0_1 = arith.constant 0 : index
    %0 = vector.load %arg2[%c0, %c0_0, %c0_1] : memref<1x4x128xf32, #tpu.memory_space<vmem>>, vector<1x4x128xf32>
    %1 = vector.shape_cast %0 : vector<1x4x128xf32> to vector<4x128xf32>
    %c0_2 = arith.constant 0 : index
    %c0_3 = arith.constant 0 : index
    %c0_4 = arith.constant 0 : index
    %2 = vector.load %arg3[%c0_2, %c0_3, %c0_4] : memref<1x4x128xf32, #tpu.memory_space<vmem>>, vector<1x4x128xf32>
    %3 = vector.shape_cast %2 : vector<1x4x128xf32> to vector<4x128xf32>
    %4 = vector.extract_strided_slice %3 {offsets = [0, 112], sizes = [4, 16], strides = [1, 1]} : vector<4x128xf32> to vector<4x16xf32>
    %c0_5 = arith.constant 0 : index
    %c0_6 = arith.constant 0 : index
    %c0_7 = arith.constant 0 : index
    %5 = vector.load %arg4[%c0_5, %c0_6, %c0_7] : memref<1x4x128xf32, #tpu.memory_space<vmem>>, vector<1x4x128xf32>
    %6 = vector.shape_cast %5 : vector<1x4x128xf32> to vector<4x128xf32>
    %7 = vector.extract_strided_slice %6 {offsets = [0, 0], sizes = [4, 16], strides = [1, 1]} : vector<4x128xf32> to vector<4x16xf32>
    %8 = tpu.concatenate %4, %1, %7 in 1 : vector<4x16xf32>, vector<4x128xf32>, vector<4x16xf32> -> vector<4x160xf32>
    %c0_8 = arith.constant 0 : index
    %c0_9 = arith.constant 0 : index
    %9 = vector.load %arg5[%c0_8, %c0_9] : memref<32x4xf32, #tpu.memory_space<vmem>>, vector<32x4xf32>
    %cst = arith.constant dense<0.000000e+00> : vector<32x160xf32>
    %10 = tpu.matmul %9, %8, %cst {dimension_numbers = #tpu.dot_dimension_numbers<[1], [0], [0], [1], [0, 0, 1, 1], [], []>} : vector<32x4xf32>, vector<4x160xf32>, vector<32x160xf32> -> vector<32x160xf32>
    %c0_10 = arith.constant 0 : index
    %c0_11 = arith.constant 0 : index
    %11 = vector.load %arg6[%c0_10, %c0_11] : memref<32x1xf32, #tpu.memory_space<vmem>>, vector<32x1xf32>
    %12 = vector.broadcast %11 : vector<32x1xf32> to vector<32x160xf32>
    %13 = arith.addf %10, %12 : vector<32x160xf32>
    %14 = tpu.iota {dimensions = array<i32: 1>} : vector<1x160xi32>
    %c16_i32 = arith.constant 16 : i32
    %15 = vector.broadcast %c16_i32 : i32 to vector<1x160xi32>
    %16 = arith.cmpi sge, %14, %15 : vector<1x160xi32>
    %c0_i32 = arith.constant 0 : i32
    %17 = arith.cmpi sgt, %arg1, %c0_i32 : i32
    %18 = vector.broadcast %17 : i1 to vector<1x160xi1>
    %19 = arith.ori %16, %18 : vector<1x160xi1>
    %c144_i32 = arith.constant 144 : i32
    %20 = vector.broadcast %c144_i32 : i32 to vector<1x160xi32>
    %21 = arith.cmpi slt, %14, %20 : vector<1x160xi32>
    %c1_i32 = arith.constant 1 : i32
    %22 = arith.cmpi slt, %arg1, %c1_i32 : i32
    %23 = vector.broadcast %22 : i1 to vector<1x160xi1>
    %24 = arith.ori %21, %23 : vector<1x160xi1>
    %25 = arith.andi %19, %24 : vector<1x160xi1>
    %cst_12 = arith.constant 0.000000e+00 : f32
    %26 = vector.shape_cast %25 : vector<1x160xi1> to vector<1x160xi1>
    %27 = vector.broadcast %26 : vector<1x160xi1> to vector<32x160xi1>
    %28 = vector.broadcast %cst_12 : f32 to vector<32x160xf32>
    %29 = arith.select %27, %13, %28 : vector<32x160xi1>, vector<32x160xf32>
    %cst_13 = arith.constant 0.000000e+00 : f32
    %30 = vector.broadcast %cst_13 : f32 to vector<32x1xf32>
    %31 = tpu.concatenate %30, %29, %30 in 1 : vector<32x1xf32>, vector<32x160xf32>, vector<32x1xf32> -> vector<32x162xf32>
    %32 = vector.extract_strided_slice %31 {offsets = [0, 0], sizes = [32, 160], strides = [1, 1]} : vector<32x162xf32> to vector<32x160xf32>
    %33 = vector.extract_strided_slice %31 {offsets = [0, 2], sizes = [32, 160], strides = [1, 1]} : vector<32x162xf32> to vector<32x160xf32>
    %c16_i32_14 = arith.constant 16 : i32
    %c0_i32_15 = arith.constant 0 : i32
    %34 = arith.cmpi eq, %c16_i32_14, %c0_i32_15 : i32
    %c1_i32_16 = arith.constant 1 : i32
    %35 = arith.select %34, %c1_i32_16, %c16_i32_14 : i32
    %36 = vector.broadcast %35 : i32 to vector<1x160xi32>
    %37 = arith.remsi %14, %36 : vector<1x160xi32>
    %c0_i32_17 = arith.constant 0 : i32
    %38 = vector.broadcast %c0_i32_17 : i32 to vector<1x160xi32>
    %39 = arith.cmpi ne, %37, %38 : vector<1x160xi32>
    %c0_i32_18 = arith.constant 0 : i32
    %40 = vector.broadcast %c0_i32_18 : i32 to vector<1x160xi32>
    %41 = arith.cmpi slt, %37, %40 : vector<1x160xi32>
    %c0_i32_19 = arith.constant 0 : i32
    %42 = arith.cmpi slt, %35, %c0_i32_19 : i32
    %43 = vector.broadcast %42 : i1 to vector<1x160xi1>
    %44 = vector.broadcast %43 : vector<1x160xi1> to vector<1x160xi1>
    %45 = arith.xori %41, %44 : vector<1x160xi1>
    %46 = arith.andi %45, %39 : vector<1x160xi1>
    %47 = vector.broadcast %35 : i32 to vector<1x160xi32>
    %48 = arith.addi %37, %47 : vector<1x160xi32>
    %49 = arith.select %46, %48, %37 : vector<1x160xi1>, vector<1x160xi32>
    %c0_i32_20 = arith.constant 0 : i32
    %50 = vector.broadcast %c0_i32_20 : i32 to vector<1x160xi32>
    %51 = arith.cmpi sgt, %49, %50 : vector<1x160xi32>
    %cst_21 = arith.constant 0.000000e+00 : f32
    %52 = vector.shape_cast %51 : vector<1x160xi1> to vector<1x160xi1>
    %53 = vector.broadcast %52 : vector<1x160xi1> to vector<32x160xi1>
    %54 = vector.broadcast %cst_21 : f32 to vector<32x160xf32>
    %55 = arith.select %53, %32, %54 : vector<32x160xi1>, vector<32x160xf32>
    %c15_i32 = arith.constant 15 : i32
    %56 = vector.broadcast %c15_i32 : i32 to vector<1x160xi32>
    %57 = arith.cmpi slt, %49, %56 : vector<1x160xi32>
    %cst_22 = arith.constant 0.000000e+00 : f32
    %58 = vector.shape_cast %57 : vector<1x160xi1> to vector<1x160xi1>
    %59 = vector.broadcast %58 : vector<1x160xi1> to vector<32x160xi1>
    %60 = vector.broadcast %cst_22 : f32 to vector<32x160xf32>
    %61 = arith.select %59, %33, %60 : vector<32x160xi1>, vector<32x160xf32>
    %c0_23 = arith.constant 0 : index
    %c0_24 = arith.constant 0 : index
    %62 = vector.load %arg7[%c0_23, %c0_24] : memref<32x9xf32, #tpu.memory_space<vmem>>, vector<32x9xf32>
    %63 = vector.extract_strided_slice %62 {offsets = [0, 0], sizes = [32, 1], strides = [1, 1]} : vector<32x9xf32> to vector<32x1xf32>
    %64 = vector.broadcast %63 : vector<32x1xf32> to vector<32x160xf32>
    %65 = arith.mulf %64, %55 : vector<32x160xf32>
    %66 = vector.extract_strided_slice %62 {offsets = [0, 1], sizes = [32, 1], strides = [1, 1]} : vector<32x9xf32> to vector<32x1xf32>
    %67 = vector.broadcast %66 : vector<32x1xf32> to vector<32x160xf32>
    %68 = arith.mulf %67, %29 : vector<32x160xf32>
    %69 = arith.addf %65, %68 : vector<32x160xf32>
    %70 = vector.extract_strided_slice %62 {offsets = [0, 2], sizes = [32, 1], strides = [1, 1]} : vector<32x9xf32> to vector<32x1xf32>
    %71 = vector.broadcast %70 : vector<32x1xf32> to vector<32x160xf32>
    %72 = arith.mulf %71, %61 : vector<32x160xf32>
    %73 = arith.addf %69, %72 : vector<32x160xf32>
    %74 = vector.extract_strided_slice %73 {offsets = [0, 0], sizes = [32, 128], strides = [1, 1]} : vector<32x160xf32> to vector<32x128xf32>
    %75 = vector.extract_strided_slice %62 {offsets = [0, 3], sizes = [32, 1], strides = [1, 1]} : vector<32x9xf32> to vector<32x1xf32>
    %76 = vector.broadcast %75 : vector<32x1xf32> to vector<32x160xf32>
    %77 = arith.mulf %76, %55 : vector<32x160xf32>
    %78 = vector.extract_strided_slice %62 {offsets = [0, 4], sizes = [32, 1], strides = [1, 1]} : vector<32x9xf32> to vector<32x1xf32>
    %79 = vector.broadcast %78 : vector<32x1xf32> to vector<32x160xf32>
    %80 = arith.mulf %79, %29 : vector<32x160xf32>
    %81 = arith.addf %77, %80 : vector<32x160xf32>
    %82 = vector.extract_strided_slice %62 {offsets = [0, 5], sizes = [32, 1], strides = [1, 1]} : vector<32x9xf32> to vector<32x1xf32>
    %83 = vector.broadcast %82 : vector<32x1xf32> to vector<32x160xf32>
    %84 = arith.mulf %83, %61 : vector<32x160xf32>
    %85 = arith.addf %81, %84 : vector<32x160xf32>
    %86 = vector.extract_strided_slice %85 {offsets = [0, 16], sizes = [32, 128], strides = [1, 1]} : vector<32x160xf32> to vector<32x128xf32>
    %87 = arith.addf %74, %86 : vector<32x128xf32>
    %88 = vector.extract_strided_slice %62 {offsets = [0, 6], sizes = [32, 1], strides = [1, 1]} : vector<32x9xf32> to vector<32x1xf32>
    %89 = vector.broadcast %88 : vector<32x1xf32> to vector<32x160xf32>
    %90 = arith.mulf %89, %55 : vector<32x160xf32>
    %91 = vector.extract_strided_slice %62 {offsets = [0, 7], sizes = [32, 1], strides = [1, 1]} : vector<32x9xf32> to vector<32x1xf32>
    %92 = vector.broadcast %91 : vector<32x1xf32> to vector<32x160xf32>
    %93 = arith.mulf %92, %29 : vector<32x160xf32>
    %94 = arith.addf %90, %93 : vector<32x160xf32>
    %95 = vector.extract_strided_slice %62 {offsets = [0, 8], sizes = [32, 1], strides = [1, 1]} : vector<32x9xf32> to vector<32x1xf32>
    %96 = vector.broadcast %95 : vector<32x1xf32> to vector<32x160xf32>
    %97 = arith.mulf %96, %61 : vector<32x160xf32>
    %98 = arith.addf %94, %97 : vector<32x160xf32>
    %99 = vector.extract_strided_slice %98 {offsets = [0, 32], sizes = [32, 128], strides = [1, 1]} : vector<32x160xf32> to vector<32x128xf32>
    %100 = arith.addf %87, %99 : vector<32x128xf32>
    %c0_25 = arith.constant 0 : index
    %c0_26 = arith.constant 0 : index
    %101 = vector.load %arg8[%c0_25, %c0_26] : memref<32x1xf32, #tpu.memory_space<vmem>>, vector<32x1xf32>
    %102 = vector.broadcast %101 : vector<32x1xf32> to vector<32x128xf32>
    %103 = arith.addf %100, %102 : vector<32x128xf32>
    %cst_27 = arith.constant 5.000000e-01 : f32
    %104 = vector.broadcast %cst_27 : f32 to vector<32x128xf32>
    %105 = arith.mulf %104, %103 : vector<32x128xf32>
    %cst_28 = arith.constant 0.707106769 : f32
    %106 = vector.broadcast %cst_28 : f32 to vector<32x128xf32>
    %107 = arith.mulf %103, %106 : vector<32x128xf32>
    %108 = math.erf %107 : vector<32x128xf32>
    %cst_29 = arith.constant 1.000000e+00 : f32
    %109 = vector.broadcast %cst_29 : f32 to vector<32x128xf32>
    %110 = arith.addf %109, %108 : vector<32x128xf32>
    %111 = arith.mulf %105, %110 : vector<32x128xf32>
    %c0_30 = arith.constant 0 : index
    %c0_31 = arith.constant 0 : index
    %112 = vector.load %arg9[%c0_30, %c0_31] : memref<4x32xf32, #tpu.memory_space<vmem>>, vector<4x32xf32>
    %cst_32 = arith.constant dense<0.000000e+00> : vector<4x128xf32>
    %113 = tpu.matmul %112, %111, %cst_32 {dimension_numbers = #tpu.dot_dimension_numbers<[1], [0], [0], [1], [0, 0, 1, 1], [], []>} : vector<4x32xf32>, vector<32x128xf32>, vector<4x128xf32> -> vector<4x128xf32>
    %c0_33 = arith.constant 0 : index
    %c0_34 = arith.constant 0 : index
    %114 = vector.load %arg10[%c0_33, %c0_34] : memref<4x1xf32, #tpu.memory_space<vmem>>, vector<4x1xf32>
    %115 = vector.broadcast %114 : vector<4x1xf32> to vector<4x128xf32>
    %116 = arith.addf %113, %115 : vector<4x128xf32>
    %c0_35 = arith.constant 0 : index
    %c0_36 = arith.constant 0 : index
    %c0_37 = arith.constant 0 : index
    %117 = vector.load %arg11[%c0_35, %c0_36, %c0_37] : memref<1x4x128xf32, #tpu.memory_space<vmem>>, vector<1x4x128xf32>
    %118 = vector.shape_cast %117 : vector<1x4x128xf32> to vector<4x128xf32>
    %119 = vector.shape_cast %116 : vector<4x128xf32> to vector<1x4x128xf32>
    tpu.vector_store %arg11[%c0_35, %c0_36, %c0_37], %119 {strides = array<i32>} : memref<1x4x128xf32, #tpu.memory_space<vmem>>, vector<1x4x128xf32>,
    return
  }
  func.func @transform_0(%arg0: i32, %arg1: i32) -> (i32, i32, i32) {
    %c0_i32 = arith.constant 0 : i32
    %c0_i32_0 = arith.constant 0 : i32
    return %arg0, %c0_i32, %arg1 : i32, i32, i32
  }
  func.func @transform_1(%arg0: i32, %arg1: i32) -> (i32, i32, i32) {
    %c1_i32 = arith.constant 1 : i32
    %0 = arith.muli %arg1, %c1_i32 : i32
    %c1_i32_0 = arith.constant 1 : i32
    %1 = arith.subi %0, %c1_i32_0 : i32
    %c0_i32 = arith.constant 0 : i32
    %2 = arith.maxsi %1, %c0_i32 : i32
    %c0_i32_1 = arith.constant 0 : i32
    %c0_i32_2 = arith.constant 0 : i32
    return %arg0, %c0_i32_1, %2 : i32, i32, i32
  }
  func.func @transform_2(%arg0: i32, %arg1: i32) -> (i32, i32, i32) {
    %c1_i32 = arith.constant 1 : i32
    %0 = arith.addi %arg1, %c1_i32 : i32
    %c1_i32_0 = arith.constant 1 : i32
    %1 = arith.muli %0, %c1_i32_0 : i32
    %c1_i32_1 = arith.constant 1 : i32
    %2 = arith.minsi %1, %c1_i32_1 : i32
    %c0_i32 = arith.constant 0 : i32
    %c0_i32_2 = arith.constant 0 : i32
    return %arg0, %c0_i32, %2 : i32, i32, i32
  }
  func.func @transform_3(%arg0: i32, %arg1: i32) -> (i32, i32) {
    %c0_i32 = arith.constant 0 : i32
    %c0_i32_0 = arith.constant 0 : i32
    %c0_i32_1 = arith.constant 0 : i32
    return %c0_i32, %c0_i32_0 : i32, i32
  }
  func.func @transform_4(%arg0: i32, %arg1: i32) -> (i32, i32) {
    %c0_i32 = arith.constant 0 : i32
    %c0_i32_0 = arith.constant 0 : i32
    %c0_i32_1 = arith.constant 0 : i32
    return %c0_i32, %c0_i32_0 : i32, i32
  }
  func.func @transform_5(%arg0: i32, %arg1: i32) -> (i32, i32) {
    %c0_i32 = arith.constant 0 : i32
    %c0_i32_0 = arith.constant 0 : i32
    %c0_i32_1 = arith.constant 0 : i32
    return %c0_i32, %c0_i32_0 : i32, i32
  }
  func.func @transform_6(%arg0: i32, %arg1: i32) -> (i32, i32) {
    %c0_i32 = arith.constant 0 : i32
    %c0_i32_0 = arith.constant 0 : i32
    %c0_i32_1 = arith.constant 0 : i32
    return %c0_i32, %c0_i32_0 : i32, i32
  }
  func.func @transform_7(%arg0: i32, %arg1: i32) -> (i32, i32) {
    %c0_i32 = arith.constant 0 : i32
    %c0_i32_0 = arith.constant 0 : i32
    %c0_i32_1 = arith.constant 0 : i32
    return %c0_i32, %c0_i32_0 : i32, i32
  }
  func.func @transform_8(%arg0: i32, %arg1: i32) -> (i32, i32) {
    %c0_i32 = arith.constant 0 : i32
    %c0_i32_0 = arith.constant 0 : i32
    %c0_i32_1 = arith.constant 0 : i32
    return %c0_i32, %c0_i32_0 : i32, i32
  }
  func.func @transform_9(%arg0: i32, %arg1: i32) -> (i32, i32, i32) {
    %c0_i32 = arith.constant 0 : i32
    %c0_i32_0 = arith.constant 0 : i32
    return %arg0, %c0_i32, %arg1 : i32, i32, i32
  }
}

</mosaic_0001>

<bundles_post_ra>
// kernel: tpu_custom_call.1
= control target key start
LH: loop header
LB: loop body
LE: loop exit
PB: predicated region body
PF: predicated region fallthrough
CT: control target
= control target key end

     0   :  { %s2330_s0 = inlined_call_operand.vmem [shape: f32[2,4,256], index: 0, kind: input, shape index: {}]   ;;  %s2331_s1 = inlined_call_operand.vmem [shape: f32[2,4,256], index: 1, kind: input, shape index: {}]   ;;  %s2332_s2 = inlined_call_operand.vmem [shape: f32[2,4,256], index: 2, kind: input, shape index: {}]   ;;  %s2333_s3 = inlined_call_operand.vmem [shape: f32[32,4], index: 3, kind: input, shape index: {}]   ;;  %s2334_s4 = inlined_call_operand.vmem [shape: f32[32,1], index: 4, kind: input, shape index: {}]   ;;  %s2335_s5 = inlined_call_operand.vmem [shape: f32[32,9], index: 5, kind: input, shape index: {}]   ;;  %s2336_s6 = inlined_call_operand.vmem [shape: f32[32,1], index: 6, kind: input, shape index: {}]   ;;  %s2337_s7 = inlined_call_operand.vmem [shape: f32[4,32], index: 7, kind: input, shape index: {}]   ;;  %s2338_s8 = inlined_call_operand.vmem [shape: f32[4,1], index: 8, kind: input, shape index: {}]   ;;  %s2339_s9 = inlined_call_operand.hbm [shape: f32[2,4,256], index: 9, kind: output, shape index: {}]  }
   0x1   :  { %2352 = sst [smem:[#allocation14_spill]] %s2330_s0 }
   0x2   :  { %14 = vsyncpa [#allocation3], 0 }
   0x3   :  { %16 = vsyncpa [#allocation3 + $0x1], 0  ;;  %s1710_s30 = smov 0   ;;  %s1712_s10 = smov 0  }
   0x4   :  { %s1714_s11 = smov 0   ;;  %s1716_s12 = smov 0  }
   0x5   :  { %s1718_s13 = smov 0   ;;  %s1720_s14 = smov 0  }
   0x6   :  { %s1722_s15 = smov 0   ;;  %s1724_s16 = smov 0  }
   0x7 LB: > { %2353 = sst [smem:[#allocation5_spill]] %s1621_s11  ;;  %s1369_s17 = sadd.s32 4294967295, %s1641_s16   ;;  %s1641_s16 = sphi %s1724_s16, %s22_s16   ;;  %s1637_s15 = sphi %s1722_s15, %s2386_s15   ;;  %s1633_s14 = sphi %s1720_s14, %s2385_s14   ;;  %s1629_s13 = sphi %s1718_s13, %s2384_s13   ;;  %s1625_s12 = sphi %s1716_s12, %s2383_s12   ;;  %s1621_s11 = sphi %s1714_s11, %s2382_s11   ;;  %s1617_s10 = sphi %s1712_s10, %s2388_s10   ;;  %s1613_s30 = sphi %s1710_s30, %s2387_s30  }
   0x8   : > { %2354 = sst [smem:[#allocation6_spill]] %s1633_s14  ;;  %s1370_s18 = sadd.s32 4294967294, %s1641_s16  }
   0x9   : > { %2355 = sst [smem:[#allocation7_spill]] %s1637_s15  ;;  %s31_s19 = sadd.s32 1, %s1633_s14 }
   0xa   : > { %p32_p0 = scmp.ge.s32.totalorder %s31_s19, 2  ;;  %s34_s20 = sadd.s32 1, %s1637_s15 }
   0xb   : > { %p275_p1 = scmp.ne.s32.totalorder %s1621_s11, %s1617_s10  ;;  %p276_p2 = scmp.eq.s32.totalorder %s1369_s17, 3 }
   0xc   : > { %s2390_s19 = smov (%p32_p0, %s31_s19), 0  ;;  %s2392_s20 = smov (!%p32_p0, %s34_s20), %s1637_s15 }
   0xd   : > { %2356 = sst [smem:[#allocation8_spill]] %s2390_s19  ;;  %s261_s21 = ssub.s32 %s1633_s14, %s2390_s19 }
   0xe   : > { %p1761_p3 = por %p276_p2, %p275_p1  ;;  %p36_p4 = scmp.ge.s32.totalorder %s2392_s20, 2 }
   0xf   : > { %p281_p5 = scmp.ne.s32.totalorder %s1617_s10, %s1613_s30  ;;  %p282_p6 = scmp.eq.s32.totalorder %s1370_s18, 3 }
  0x10   : > { %p1375_p7 = scmp.ge.s32.totalorder %s1641_s16, 1  ;;  %s2394_s20 = smov (%p36_p4, %s2392_s20), 0 }
  0x11   : > { %2358 = sst [smem:[#allocation9_spill]] %s2394_s20  ;;  %p1770_p8 = por %p282_p6, %p281_p5 }
  0x12   : > { %p363_p9 = scmp.lt.s32.totalorder %s1641_s16, 5  ;;  %s260_s24 = ssub.s32 %s1637_s15, %s2394_s20 }
  0x13   : > { %s2359_s23 = scalar_select %p1770_p8, 1, 0 }
  0x14   : > { %s265_s25 = sadd.s32 1, %s1621_s11  ;;  %s262_s26 = sor.u32 %s261_s21, %s260_s24 }
  0x15   : > { %2360 = sst [smem:[#allocation10_spill]] %s2359_s23  ;;  %p364_p10 = pnand %p1375_p7, %p363_p9 }
  0x16   : > { %p263_p11 = scmp.eq.s32.totalorder %s262_s26, 0 }
  0x17   : > { %367 = sbr.rel (%p364_p10) target bundleno = 995 (0x3e3), region = 56 }
  0x18   : > { %s1779_s27 = scalar_select %p263_p11, %s1621_s11, %s265_s25  }
  0x1a   : > { %2361 = sst [smem:[#allocation11_spill]] %s1779_s27 }
  0x1c   : > { %p424_p12 = scmp.lt.s32.totalorder %s1629_s13, 1  ;;  %p426_p13 = scmp.lt.s32.totalorder %s1625_s12, 1  ;;  %v2346_v1 = vmov 0.0   ;;  %v485_v4 = vld [vmem:[%s2334_s4 + $0x18] sm:$0xff]  ;;  %v1645_v5 = vmov 0   ;;  %v484_v6 = vld [vmem:[%s2334_s4 + $0x10] sm:$0xff]  ;;  %v615_v25 = vlaneseq }
  0x1d   : > { %s1379_s28 = sadd.s32 4294967295, %s1625_s12  ;;  %s446_s25 = sadd.s32 1, %s1625_s12  ;;  %590 = vmatprep.mubr.f32.mxu0 %v2346_v1  ;;  %1411 = vmatprep.subr.mxu1 %v2346_v1  ;;  %v483_v7 = vld [vmem:[%s2334_s4 + $0x8] sm:$0xff]  ;;  %v1814_v8 = vld [vmem:[%s2335_s5 + $0x10] sm:$0xff]  ;;  %v1646_v9 = vmov 4   ;;  %v482_v10 = vld [vmem:[%s2334_s4] sm:$0xff] }
  0x1e   : > { %s425_s29 = scalar_select %p424_p12, %s1629_s13, 1  ;;  %1509 = vset.pattern.permute.xlu1 %v1645_v5  ;;  %1510 = vset.pattern.permute.xlu0 %v1645_v5  ;;  %v1824_v11 = vld [vmem:[%s2335_s5 + $0x18] sm:$0xff]  ;;  %v1647_v12 = vmov 3   ;;  %v1648_v13 = vmov 5   ;;  %v1649_v14 = vmov 6   ;;  %vm475_vm0 = vcmask 130048  }
  0x1f   : > { %s427_s17 = scalar_select %p426_p13, %s1625_s12, 1  ;;  %vm519_vm1 = vcmask 1043456   ;;  %v478_v19 = vld [vmem:[%s2333_s3] sm:$0xff]  ;;  %vm506_vm2 = vcmask 31744   ;;  %v479_v21 = vld [vmem:[%s2333_s3 + $0x8] sm:$0xff]  ;;  %v480_v22 = vld [vmem:[%s2333_s3 + $0x10] sm:$0xff] }
  0x20   : > { %s1377_s18 = sshll.u32 %s425_s29, 1  ;;  %p433_p0 = scmp.gt.s32.totalorder %s1379_s28, 0  ;;  %v481_v23 = vld [vmem:[%s2333_s3 + $0x18] sm:$0xff]  ;;  %v1650_v24 = vmov 7   ;;  %v1852_v27 = vand.u32 127, %v615_v25  ;;  %v1906_v58 = vld [vmem:[%s2335_s5 + $0x8] sm:$0xff] }
  0x21   : > { %s429_s21 = sadd.s32 %s1377_s18, %s427_s17  ;;  %p1380_p1 = scmp.lt.s32.totalorder %s1379_s28, 1  ;;  %v1923_v61 = vld [vmem:[%s2335_s5] sm:$0xff]  ;;  %v1652_v62 = vmov 8   ;;  %v1653_v63 = vmov 2   ;;  %vm672_vm9 = vcmask 7168   ;;  %vm689_vm10 = vcmask 269312  }
  0x22   : > { %s1378_s24 = sshll.u32 %s429_s21, 2  ;;  %s2362_s0 = sld [smem:[#allocation14_spill]]  ;;  %v1857_v30 = vadd.s32 128, %v1852_v27  ;;  %vm618_vm3 = vcmp.ge.s32.totalorder %v1852_v27, 16  ;;  %vm762_vm12 = vcmask 1031168  }
  0x23   : > { %p447_p2 = scmp.lt.s32.totalorder %s446_s25, 1  ;;  %s1644_s15 = smov 16  }
  0x24   : > { %s2396_s28 = smov (!%p433_p0, %s1379_s28), 0  ;;  %p620_p4 = scmp.gt.s32.totalorder %s1625_s12, 0  ;;  %vm627_vm5 = vcmp.lt.s32.totalorder %v1857_v30, 144 }
  0x25   : > { %s2398_s25 = smov (!%p447_p2, %s446_s25), 1  ;;  %s2400_s28 = smov (!%p1380_p1, %s2396_s28), 1 }
  0x26   : > { %s2402_s25 = smov (!%p447_p2, %s2398_s25), 1  ;;  %s440_s29 = sadd.s32 %s2400_s28, %s1377_s18 }
  0x27   : > { %s1386_s17 = sshll.u32 %s440_s29, 2  ;;  %s454_s21 = sadd.s32 %s1377_s18, %s2402_s25 }
  0x28   : > { %s431_s19 = scalar_lea.vmem %s2362_s0, %s1378_s24  ;;  %s442_s20 = scalar_lea.vmem %s2331_s1, %s1386_s17 }
  0x29   : > { %v460_v0 = vld [vmem:[%s431_s19] sm:$0xf]  ;;  %s1391_s24 = sshll.u32 %s454_s21, 2  ;;  %s1654_s29 = smov 126  }
  0x2a   : > { %468 = vrot.lane.b32.xlu0 %v460_v0, %s1644_s15  ;;  %v461_v2 = vld [vmem:[%s442_s20] sm:$0xf]  ;;  %s456_s0 = scalar_lea.vmem %s2332_s2, %s1391_s24  ;;  %s1656_s14 = smov 112  }
  0x2b   : > { %464 = vrot.lane.b32.xlu1 %v461_v2, %s1644_s15  ;;  %v462_v3 = vld [vmem:[%s456_s0] sm:$0xf]  ;;  %s621_s28 = scalar_select %p620_p4, 1, 0 }
  0x2c   : > { %s629_s18 = scalar_select %p426_p13, 1, 0 }
  0x2d   : > { %v622_v29 = vstv %s621_s28  ;;  %s1651_s0 = smov 1   ;;  %s1657_s27 = smov 96  }
  0x2e   : > { %472 = vrot.lane.b32.xlu0 %v462_v3, %s1644_s15  ;;  %v630_v31 = vstv %s629_s18  ;;  %vm623_vm4 = vcmp.eq.s32.totalorder %v622_v29, 1  ;;  %s421_s25 = sand.u32 1, %s1617_s10   ;;  %s1400_s17 = sshll.u32 %s1629_s13, 1 }
  0x2f   : > { %503 = vperm.xlu1 %1509, %v485_v4   ;;  %vm631_vm6 = vcmp.eq.s32.totalorder %v630_v31, 1  ;;  %vm1861_vm7 = vmor %vm618_vm3, %vm623_vm4  ;;  %vm1164_vm3 = vcmask 261120   ;;  %s1251_s21 = sadd.s32 %s1625_s12, %s1400_s17  ;;  %s1240_s28 = scalar_lea.sflag [#allocation3], %s421_s25 }
  0x30   : > { %vm1865_vm8 = vmor %vm627_vm5, %vm631_vm6  ;;  %s1401_s20 = sshll.u32 %s1251_s21, 6  ;;  %s1659_s12 = smov [#allocation2]  }
  0x31   : > { %s1553_s13 = sshll.u32 %s1659_s12, 4  ;;  %s1554_s13 = int_to_ptr.vmem [resolvable:$false] %s1553_s13 }
  0x32   : > { %498 = vperm.xlu0 %1510, %v484_v6  }
  0x33   : > { %493 = vperm.xlu1 %1509, %v483_v7  }
  0x36   : > { %1513 = vset.pattern.permute.xlu0 %v1646_v9 }
  0x37   : > { %892 = vperm.xlu0 %1513, %v1814_v8   ;;  %488 = vperm.xlu1 %1509, %v482_v10  }
  0x3b   : > { %1511 = vset.pattern.permute.xlu1 %v1646_v9  ;;  %1516 = vset.pattern.permute.xlu0 %v1650_v24 }
  0x3c   : > { %896 = vperm.xlu1 %1511, %v1824_v11  }
  0x40   : > { %1512 = vset.pattern.permute.xlu1 %v1647_v12 }
  0x41   : > { %868 = vperm.xlu1 %1512, %v1814_v8  }
  0x45   : > { %1514 = vset.pattern.permute.xlu1 %v1648_v13 }
  0x46   : > { %928 = vperm.xlu1 %1514, %v1824_v11  }
  0x4a   : > { %1515 = vset.pattern.permute.xlu1 %v1649_v14 }
  0x4b   : > { %997 = vperm.xlu1 %1515, %v1824_v11  }
  0x4f   : > { %1518 = vset.pattern.permute.xlu1 %v1647_v12 }
  0x9c   : > { %v469_v15 = vpop.permute.xlu0 %468 }
  0x9d   : > { %v465_v16 = vpop.permute.xlu1 %464 }
  0x9e   : > { %v476_v20 = vsel %vm475_vm0, %v465_v16, %v469_v15 }
  0xa0   : > { %v473_v17 = vpop.permute.xlu0 %472 }
  0xa1   : > { %v477_v18 = vsel %vm475_vm0, %v469_v15, %v473_v17  ;;  %vm1658_vm0 = vmmov 0  }
  0xa2   : > { %1392 = vmatprep.subr.msk.mxu0 %vm519_vm1, %v477_v18 }
  0xa3   : > { %1393 = vmatpush1.msk.msra.mxu0 %vm519_vm1, %v476_v20  ;;  %vm971_vm1 = vcmask 916480  }
  0xa4   : > { %1394 = vmatmul.mubr.msk.f32.vlgmr.msra.gmra.mxu0 %vm506_vm2, %v478_v19 }
  0xa5   : > { %596 = vmatprep.mubr.f32.mxu0 %v2346_v1 }
  0xa8   : > { %1395 = vmatmul.mubr.msk.f32.gmra.mxu0 %vm506_vm2, %v479_v21 }
  0xa9   : > { %602 = vmatprep.mubr.f32.mxu0 %v2346_v1 }
  0xaa   : > { %v504_v26 = vpop.permute.xlu1 %503 }
  0xac   : > { %1396 = vmatmul.mubr.msk.f32.gmra.mxu0 %vm506_vm2, %v480_v22 }
  0xad   : > { %608 = vmatprep.mubr.f32.mxu0 %v2346_v1  ;;  %v499_v44 = vpop.permute.xlu0 %498 }
  0xae   : > { %v494_v28 = vpop.permute.xlu1 %493 }
  0xb0   : > { %1397 = vmatmul.mubr.msk.f32.gmra.mxu0 %vm506_vm2, %v481_v23  ;;  %vm1096_vm2 = vcmask 785408  }
  0xb2   : > { %v489_v32 = vpop.permute.xlu1 %488  ;;  %v1957_v4 = vpop.permute.xlu0 %892 }
  0xb7   : > { %v1951_v0 = vpop.permute.xlu1 %896 }
  0xbc   : > { %v1953_v2 = vpop.permute.xlu1 %868 }
  0xc1   : > { %v1955_v3 = vpop.permute.xlu1 %928 }
  0xc6   : > { %v1959_v6 = vpop.permute.xlu1 %997 }
 0x164   : > { %v592_v33 = vpop.f32.mrf.mxu0 }
 0x165   : > { %v593_v35 = vadd.f32 %v592_v33, %v489_v32  ;;  %v1655_v33 = vmov 1  }
 0x166   : > { %v594_v36 = vpop.f32.mrf.mxu0 }
 0x167   : > { %v1871_v38 = vsel %vm1861_vm7, %v593_v35, 0.0  ;;  %v595_v39 = vadd.f32 %v594_v36, %v489_v32 }
 0x168   : > { %2367 = vst [vmem:[#allocation12_spill] sm:$0xff] %v1871_v38  ;;  %v598_v40 = vpop.f32.mrf.mxu0  ;;  %656 = vrot.lane.b32.xlu0 %v1871_v38, %s1651_s0 }
 0x169   : > { %v599_v41 = vadd.f32 %v598_v40, %v494_v28  ;;  %v1876_v42 = vsel %vm1865_vm8, %v595_v39, 0.0  ;;  %v1112_v40 = vld [vmem:[%s2336_s6 + $0x18] sm:$0xff] }
 0x16a   : > { %v600_v43 = vpop.f32.mrf.mxu0  ;;  %658 = vrot.lane.b32.xlu1 %v1876_v42, %s1651_s0 }
 0x16b   : > { %v1881_v45 = vsel %vm1861_vm7, %v599_v41, 0.0  ;;  %v601_v46 = vadd.f32 %v600_v43, %v494_v28  ;;  %v1111_v41 = vld [vmem:[%s2336_s6 + $0x10] sm:$0xff] }
 0x16c   : > { %v604_v47 = vpop.f32.mrf.mxu0  ;;  %660 = vrot.lane.b32.xlu0 %v1881_v45, %s1651_s0 }
 0x16d   : > { %v605_v48 = vadd.f32 %v604_v47, %v499_v44  ;;  %v1886_v49 = vsel %vm1865_vm8, %v601_v46, 0.0 }
 0x16e   : > { %v606_v50 = vpop.f32.mrf.mxu0  ;;  %662 = vrot.lane.b32.xlu1 %v1886_v49, %s1651_s0 }
 0x16f   : > { %v1891_v51 = vsel %vm1861_vm7, %v605_v48, 0.0  ;;  %v607_v52 = vadd.f32 %v606_v50, %v499_v44 }
 0x170   : > { %v610_v53 = vpop.f32.mrf.mxu0  ;;  %664 = vrot.lane.b32.xlu0 %v1891_v51, %s1651_s0 }
 0x171   : > { %v1896_v54 = vsel %vm1865_vm8, %v607_v52, 0.0  ;;  %v611_v55 = vadd.f32 %v610_v53, %v504_v26 }
 0x172   : > { %v612_v56 = vpop.f32.mrf.mxu0  ;;  %666 = vrot.lane.b32.xlu1 %v1896_v54, %s1651_s0 }
 0x173   : > { %v1901_v57 = vsel %vm1861_vm7, %v611_v55, 0.0  ;;  %v613_v59 = vadd.f32 %v612_v56, %v504_v26  ;;  %v705_v26 = vand.u32 15, %v1857_v30 }
 0x174   : > { %668 = vrot.lane.b32.xlu0 %v1901_v57, %s1651_s0 }
 0x175   : > { %v1913_v60 = vsel %vm1865_vm8, %v613_v59, 0.0  ;;  %vm2001_vm11 = vcmp.gt.s32.totalorder %v705_v26, 0  ;;  %vm2095_vm15 = vcmp.lt.s32.totalorder %v705_v26, 15 }
 0x176   : > { %864 = vperm.xlu1 %1518, %v1906_v58  }
 0x178   : > { %1021 = vperm.xlu0 %1516, %v1824_v11  }
 0x17a   : > { %670 = vrot.lane.b32.xlu1 %v1913_v60, %s1651_s0  ;;  %s1555_s0 = scalar_lea.vmem %s1554_s13, 128 }
 0x17b   : > { %1519 = vset.pattern.permute.xlu1 %v1646_v9 }
 0x17c   : > { %1517 = vset.pattern.permute.xlu0 %v1647_v12 }
 0x17d   : > { %872 = vperm.xlu0 %1517, %v1824_v11  }
 0x17e   : > { %888 = vperm.xlu1 %1519, %v1906_v58  }
 0x181   : > { %860 = vperm.xlu0 %1517, %v1923_v61  }
 0x182   : > { %1520 = vset.pattern.permute.xlu1 %v1649_v14 }
 0x183   : > { %993 = vperm.xlu1 %1520, %v1814_v8  }
 0x185   : > { %1524 = vset.pattern.permute.xlu0 %v1649_v14 }
 0x186   : > { %989 = vperm.xlu0 %1524, %v1906_v58  }
 0x187   : > { %1521 = vset.pattern.permute.xlu1 %v1650_v24 }
 0x188   : > { %1017 = vperm.xlu1 %1521, %v1814_v8  }
 0x18a   : > { %1525 = vset.pattern.permute.xlu0 %v1648_v13 }
 0x18b   : > { %924 = vperm.xlu0 %1525, %v1814_v8  }
 0x18c   : > { %1522 = vset.pattern.permute.xlu1 %v1646_v9 }
 0x18d   : > { %884 = vperm.xlu1 %1522, %v1923_v61  }
 0x18f   : > { %916 = vperm.xlu0 %1525, %v1923_v61  }
 0x191   : > { %1523 = vset.pattern.permute.xlu1 %v1648_v13 }
 0x192   : > { %920 = vperm.xlu1 %1523, %v1906_v58  }
 0x193   : > { %1528 = vset.pattern.permute.xlu0 %v1652_v62 }
 0x194   : > { %1053 = vperm.xlu0 %1528, %v1824_v11  }
 0x196   : > { %1526 = vset.pattern.permute.xlu1 %v1650_v24 }
 0x197   : > { %1013 = vperm.xlu1 %1526, %v1906_v58  }
 0x198   : > { %1045 = vperm.xlu0 %1528, %v1906_v58  }
 0x19b   : > { %1527 = vset.pattern.permute.xlu1 %v1652_v62 }
 0x19c   : > { %1049 = vperm.xlu1 %1527, %v1814_v8   ;;  %1041 = vperm.xlu0 %1528, %v1923_v61  }
 0x1a0   : > { %1529 = vset.pattern.permute.xlu1 %v1649_v14  ;;  %1533 = vset.pattern.permute.xlu0 %v1653_v63 }
 0x1a1   : > { %985 = vperm.xlu1 %1529, %v1923_v61  }
 0x1a5   : > { %1530 = vset.pattern.permute.xlu1 %v1650_v24 }
 0x1a6   : > { %1009 = vperm.xlu1 %1530, %v1923_v61  }
 0x1aa   : > { %1531 = vset.pattern.permute.xlu1 %v1645_v5 }
 0x1da   : > { %v657_v7 = vpop.permute.xlu0 %656 }
 0x1db   : > { %v1962_v9 = vsel %vm672_vm9, 0.0, %v657_v7 }
 0x1dc   : > { %v659_v10 = vpop.permute.xlu1 %658  ;;  %746 = vrot.lane.b32.xlu1 %v1962_v9, %s1654_s29 }
 0x1dd   : > { %v673_v19 = vsel %vm672_vm9, %v657_v7, %v659_v10 }
 0x1de   : > { %v661_v12 = vpop.permute.xlu0 %660  ;;  %v1985_v23 = vsel %vm689_vm10, %v673_v19, 0.0 }
 0x1df   : > { %v1967_v13 = vsel %vm672_vm9, 0.0, %v661_v12 }
 0x1e0   : > { %v663_v14 = vpop.permute.xlu1 %662  ;;  %750 = vrot.lane.b32.xlu1 %v1967_v13, %s1654_s29 }
 0x1e1   : > { %v674_v15 = vsel %vm672_vm9, %v661_v12, %v663_v14  ;;  %v698_v14 = vand.u32 15, %v1852_v27 }
 0x1e2   : > { %v665_v16 = vpop.permute.xlu0 %664  ;;  %v691_v17 = vsel %vm689_vm10, %v674_v15, 0.0 }
 0x1e3   : > { %v1974_v18 = vsel %vm672_vm9, 0.0, %v665_v16  ;;  %v2009_v31 = vsel %vm2001_vm11, %v691_v17, 0.0  ;;  %vm2077_vm13 = vcmp.gt.s32.totalorder %v698_v14, 0  ;;  %vm2082_vm14 = vcmp.lt.s32.totalorder %v698_v14, 15 }
 0x1e4   : > { %v667_v20 = vpop.permute.xlu1 %666  ;;  %752 = vrot.lane.b32.xlu1 %v691_v17, %s1654_s29  ;;  %754 = vrot.lane.b32.xlu0 %v1974_v18, %s1654_s29  ;;  %v2147_v28 = vsel %vm2077_vm13, %v1974_v18, 0.0 }
 0x1e5   : > { %v675_v21 = vsel %vm672_vm9, %v665_v16, %v667_v20 }
 0x1e6   : > { %v1982_v22 = vsel %vm689_vm10, %v675_v21, 0.0  ;;  %v669_v24 = vpop.permute.xlu0 %668 }
 0x1e7   : > { %v1992_v25 = vsel %vm672_vm9, 0.0, %v669_v24 }
 0x1e8   : > { %748 = vrot.lane.b32.xlu0 %v1985_v23, %s1654_s29  ;;  %756 = vrot.lane.b32.xlu1 %v1982_v22, %s1654_s29 }
 0x1ec   : > { %848 = vperm.xlu0 %1533, %v1824_v11   ;;  %758 = vrot.lane.b32.xlu1 %v1992_v25, %s1654_s29 }
 0x1f0   : > { %844 = vperm.xlu0 %1533, %v1814_v8  }
 0x1f1   : > { %v2005_v29 = vpop.permute.xlu1 %864 }
 0x1f2   : > { %v2013_v32 = vmul.f32 %v2005_v29, %v2009_v31 }
 0x1f3   : > { %v2050_v43 = vpop.permute.xlu0 %1021 }
 0x1f4   : > { %1536 = vset.pattern.permute.xlu0 %v1655_v33 }
 0x1f5   : > { %v671_v34 = vpop.permute.xlu1 %670  ;;  %824 = vperm.xlu0 %1536, %v1824_v11  }
 0x1f6   : > { %v676_v35 = vsel %vm672_vm9, %v669_v24, %v671_v34  ;;  %v2090_v24 = vsel %vm2001_vm11, %v1985_v23, 0.0  ;;  %v2102_v34 = vsel %vm2077_vm13, %v1962_v9, 0.0 }
 0x1f7   : > { %v693_v36 = vsel %vm689_vm10, %v676_v35, 0.0  ;;  %2376 = vst [vmem:[#allocation13_spill] sm:$0xff] %v2102_v34  ;;  %v2107_v35 = vsel %vm2077_vm13, %v1967_v13, 0.0 }
 0x1f8   : > { %760 = vrot.lane.b32.xlu1 %v693_v36, %s1654_s29  ;;  %v2021_v37 = vsel %vm2001_vm11, %v693_v36, 0.0  ;;  %v2054_v46 = vpop.permute.xlu0 %872  ;;  %s1376_s29 = sshll.u32 %s421_s25, 2 }
 0x1f9   : > { %v2025_v39 = vmul.f32 %v1959_v6, %v2021_v37  ;;  %812 = vperm.xlu0 %1536, %v1923_v61   ;;  %s423_s24 = scalar_lea.vmem [#allocation2], %s1376_s29 }
 0x1fa   : > { %s1255_s19 = sshll.u32 %s423_s24, 4  ;;  %s1256_s19 = int_to_ptr.vmem [resolvable:$true] %s1255_s19 }
 0x1fb   : > { %s1549_s18 = scalar_lea.vmem %s1256_s19, 64  ;;  %p1556_p9 = scmp.lt.s32.totalorder %s1256_s19, %s1554_s13 }
 0x1fc   : > { %804 = vperm.xlu1 %1531, %v1824_v11   ;;  %v889_v11 = vpop.permute.xlu1 %888  ;;  %v861_v48 = vpop.permute.xlu0 %860  ;;  %p1550_p5 = scmp.ne.s32.totalorder %s1256_s19, %s1549_s18  ;;  %p1557_p10 = scmp.lt.s32.totalorder %s1555_s0, %s1549_s18 }
 0x1fd   : > { %1539 = vset.pattern.permute.xlu0 %v1645_v5  ;;  %v901_v23 = vmul.f32 %v889_v11, %v1881_v45  ;;  %v876_v36 = vmul.f32 %v861_v48, %v2090_v24  ;;  %v875_v30 = vmul.f32 %v861_v48, %v2102_v34  ;;  %v902_v14 = vmul.f32 %v889_v11, %v1886_v49 }
 0x1fe   : > { %1130 = vperm.xlu0 %1539, %v1112_v40   ;;  %p1551_p6 = pnand %p1550_p5, %p1761_p3  ;;  %p1558_p11 = por %p1557_p10, %p1556_p9 }
 0x200   : > { %799 = vperm.xlu1 %1531, %v1814_v8   ;;  %v2052_v44 = vpop.permute.xlu1 %993  ;;  %p1552_p7 = pneg %p1551_p6 }
 0x201   : > { %v2058_v53 = vpop.permute.xlu0 %989 }
 0x202   : > { %1125 = vperm.xlu0 %1539, %v1111_v41   ;;  %p1559_p12 = pnand %p1558_p11, %p1552_p7 }
 0x204   : > { %1532 = vset.pattern.permute.xlu1 %v1655_v33  ;;  %v2056_v47 = vpop.permute.xlu1 %1017 }
 0x205   : > { %820 = vperm.xlu1 %1532, %v1814_v8   ;;  %v1110_v8 = vld [vmem:[%s2336_s6 + $0x8] sm:$0xff] }
 0x206   : > { %v2062_v56 = vpop.permute.xlu0 %924 }
 0x208   : > { %v885_v50 = vpop.permute.xlu1 %884 }
 0x209   : > { %1534 = vset.pattern.permute.xlu1 %v1645_v5  ;;  %v900_v19 = vmul.f32 %v885_v50, %v1876_v42  ;;  %v899_v27 = vmul.f32 %v885_v50, %v1871_v38 }
 0x20a   : > { %794 = vperm.xlu1 %1534, %v1906_v58  }
 0x20d   : > { %v921_v52 = vpop.permute.xlu1 %920 }
 0x20e   : > { %1535 = vset.pattern.permute.xlu1 %v1655_v33  ;;  %v906_v33 = vmul.f32 %v1951_v0, %v1913_v60 }
 0x20f   : > { %816 = vperm.xlu1 %1535, %v1906_v58  }
 0x212   : > { %v2060_v55 = vpop.permute.xlu1 %1013 }
 0x213   : > { %1537 = vset.pattern.permute.xlu1 %v1645_v5 }
 0x214   : > { %789 = vperm.xlu1 %1537, %v1923_v61  }
 0x218   : > { %1538 = vset.pattern.permute.xlu1 %v1653_v63 }
 0x219   : > { %840 = vperm.xlu1 %1538, %v1906_v58   ;;  %v2064_v58 = vpop.permute.xlu1 %1049 }
 0x21d   : > { %836 = vperm.xlu1 %1538, %v1923_v61   ;;  %v2066_v59 = vpop.permute.xlu1 %985 }
 0x221   : > { %1540 = vset.pattern.permute.xlu1 %v1645_v5  ;;  %v917_v5 = vpop.permute.xlu0 %916  ;;  %v2070_v62 = vpop.permute.xlu1 %1009 }
 0x222   : > { %1120 = vperm.xlu1 %1540, %v1110_v8   ;;  %v908_v8 = vadd.f32 %v900_v19, %v876_v36 }
 0x225   : > { %v2068_v61 = vpop.permute.xlu0 %1053 }
 0x229   : > { %v2072_v63 = vpop.permute.xlu0 %1045 }
 0x22d   : > { %v2074_v10 = vpop.permute.xlu0 %1041 }
 0x24e   : > { %v747_v7 = vpop.permute.xlu1 %746 }
 0x252   : > { %v751_v12 = vpop.permute.xlu1 %750 }
 0x256   : > { %v753_v15 = vpop.permute.xlu1 %752  ;;  %v755_v16 = vpop.permute.xlu0 %754 }
 0x257   : > { %v764_v21 = vsel %vm762_vm12, %v751_v12, %v753_v15  ;;  %v2123_v13 = vsel %vm2095_vm15, %v753_v15, 0.0  ;;  %v877_v15 = vmul.f32 %v2005_v29, %v2107_v35  ;;  %v910_v29 = vadd.f32 %v902_v14, %v2013_v32 }
 0x258   : > { %v2114_v26 = vsel %vm2082_vm14, %v764_v21, 0.0  ;;  %v907_v21 = vadd.f32 %v899_v27, %v875_v30  ;;  %v903_v14 = vmul.f32 %v1957_v4, %v1891_v51 }
 0x259   : > { %v933_v36 = vmul.f32 %v921_v52, %v2114_v26  ;;  %v909_v11 = vadd.f32 %v901_v23, %v877_v15  ;;  %v1002_v23 = vmul.f32 %v2058_v53, %v2107_v35  ;;  %v1058_v18 = vmul.f32 %v2072_v63, %v2114_v26 }
 0x25a   : > { %v749_v40 = vpop.permute.xlu0 %748  ;;  %v757_v50 = vpop.permute.xlu1 %756 }
 0x25b   : > { %v763_v41 = vsel %vm762_vm12, %v747_v7, %v749_v40  ;;  %v2119_v9 = vsel %vm2095_vm15, %v749_v40, 0.0  ;;  %v729_v7 = vsel %vm2001_vm11, %v1982_v22, 0.0  ;;  %v780_v1 = vsel %vm2095_vm15, %v757_v50, 0.0 }
 0x25c   : > { %v2127_v12 = vsel %vm2082_vm14, %v763_v41, 0.0  ;;  %v932_v48 = vmul.f32 %v917_v5, %v2119_v9  ;;  %v934_v41 = vmul.f32 %v921_v52, %v2123_v13  ;;  %v880_v38 = vmul.f32 %v1953_v2, %v729_v7 }
 0x25d   : > { %v931_v19 = vmul.f32 %v917_v5, %v2127_v12  ;;  %v765_v22 = vsel %vm762_vm12, %v755_v16, %v757_v50  ;;  %v1026_v52 = vmul.f32 %v2060_v55, %v1881_v45  ;;  %v904_v5 = vmul.f32 %v1957_v4, %v1896_v54 }
 0x25e   : > { %v940_v40 = vadd.f32 %v932_v48, %v908_v8  ;;  %v936_v16 = vmul.f32 %v2062_v56, %v780_v1  ;;  %v941_v27 = vadd.f32 %v933_v36, %v909_v11  ;;  %v942_v30 = vadd.f32 %v934_v41, %v910_v29 }
 0x25f   : > { %v939_v34 = vadd.f32 %v931_v19, %v907_v21  ;;  %v2162_v32 = vsel %vm2082_vm14, %v765_v22, 0.0  ;;  %v912_v8 = vadd.f32 %v904_v5, %v880_v38  ;;  %v1029_v50 = vmul.f32 %v2056_v47, %v1896_v54  ;;  %v759_v21 = vpop.permute.xlu1 %758 }
 0x260   : > { %957 = vrot.lane.b32.xlu1 %v940_v40, %s1656_s14  ;;  %v1034_v48 = vadd.f32 %v1026_v52, %v1002_v23  ;;  %v935_v15 = vmul.f32 %v2062_v56, %v2162_v32  ;;  %v1005_v36 = vmul.f32 %v2052_v44, %v729_v7  ;;  %v1061_v38 = vmul.f32 %v2064_v58, %v780_v1 }
 0x261   : > { %955 = vrot.lane.b32.xlu0 %v939_v34, %s1656_s14  ;;  %v879_v34 = vmul.f32 %v1953_v2, %v2147_v28  ;;  %v944_v19 = vadd.f32 %v936_v16, %v912_v8  ;;  %v2179_v54 = vsel %vm2077_vm13, %v1992_v25, 0.0  ;;  %v1028_v40 = vmul.f32 %v2056_v47, %v1891_v51 }
 0x262   : > { %v1066_v2 = vadd.f32 %v1058_v18, %v1034_v48  ;;  %v881_v41 = vmul.f32 %v2054_v46, %v2179_v54  ;;  %v1037_v56 = vadd.f32 %v1029_v50, %v1005_v36  ;;  %v1004_v1 = vmul.f32 %v2052_v44, %v2147_v28 }
 0x263   : > { %v911_v4 = vadd.f32 %v903_v14, %v879_v34  ;;  %v1060_v25 = vmul.f32 %v2064_v58, %v2162_v32  ;;  %v905_v47 = vmul.f32 %v1951_v0, %v1901_v57  ;;  %v882_v52 = vmul.f32 %v2054_v46, %v2021_v37 }
 0x264   : > { %959 = vrot.lane.b32.xlu1 %v941_v27, %s1656_s14  ;;  %v1069_v29 = vadd.f32 %v1061_v38, %v1037_v56  ;;  %v1036_v5 = vadd.f32 %v1028_v40, %v1004_v1  ;;  %v1030_v58 = vmul.f32 %v2050_v43, %v1901_v57  ;;  %v1006_v20 = vmul.f32 %v1959_v6, %v2179_v54 }
 0x265   : > { %961 = vrot.lane.b32.xlu0 %v942_v30, %s1656_s14  ;;  %v943_v17 = vadd.f32 %v935_v15, %v911_v4  ;;  %v913_v16 = vadd.f32 %v905_v47, %v881_v41  ;;  %v914_v30 = vadd.f32 %v906_v33, %v882_v52  ;;  %v1031_v8 = vmul.f32 %v2050_v43, %v1913_v60 }
 0x266   : > { %v1068_v46 = vadd.f32 %v1060_v25, %v1036_v5  ;;  %v1038_v34 = vadd.f32 %v1030_v58, %v1006_v20  ;;  %v1027_v6 = vmul.f32 %v2060_v55, %v1886_v49  ;;  %v1025_v14 = vmul.f32 %v2070_v62, %v1876_v42 }
 0x267   : > { %v1039_v48 = vadd.f32 %v1031_v8, %v2025_v39  ;;  %v1059_v60 = vmul.f32 %v2072_v63, %v2123_v13  ;;  %v1109_v39 = vld [vmem:[%s2336_s6] sm:$0xff]  ;;  %v1001_v49 = vmul.f32 %v2066_v59, %v2090_v24  ;;  %v1057_v55 = vmul.f32 %v2074_v10, %v2119_v9  ;;  %v849_v4 = vpop.permute.xlu0 %848 }
 0x268   : > { %965 = vrot.lane.b32.xlu1 %v944_v19, %s1656_s14  ;;  %v1056_v13 = vmul.f32 %v2074_v10, %v2127_v12 }
 0x269   : > { %1084 = vrot.lane.b32.xlu0 %v1066_v2, %s1657_s27 }
 0x26a   : > { %v761_v7 = vpop.permute.xlu1 %760 }
 0x26b   : > { %v766_v11 = vsel %vm762_vm12, %v759_v21, %v761_v7  ;;  %v782_v22 = vsel %vm2095_vm15, %v761_v7, 0.0  ;;  %v1003_v21 = vmul.f32 %v2058_v53, %v2009_v31  ;;  %v1033_v31 = vadd.f32 %v1025_v14, %v1001_v49  ;;  %v2378_v53 = vld [vmem:[#allocation13_spill] sm:$0xff]  ;;  %v845_v56 = vpop.permute.xlu0 %844 }
 0x26c   : > { %v2200_v44 = vsel %vm2082_vm14, %v766_v11, 0.0  ;;  %963 = vrot.lane.b32.xlu1 %v943_v17, %s1656_s14  ;;  %v938_v37 = vmul.f32 %v1955_v3, %v782_v22  ;;  %v1063_v0 = vmul.f32 %v2068_v61, %v782_v22  ;;  %v1000_v63 = vmul.f32 %v2066_v59, %v2378_v53 }
 0x26d   : > { %v937_v27 = vmul.f32 %v1955_v3, %v2200_v44  ;;  %1090 = vrot.lane.b32.xlu0 %v1069_v29, %s1657_s27  ;;  %v1062_v23 = vmul.f32 %v2068_v61, %v2200_v44  ;;  %v1035_v42 = vadd.f32 %v1027_v6, %v1003_v21  ;;  %v2377_v61 = vld [vmem:[#allocation12_spill] sm:$0xff]  ;;  %v1065_v36 = vadd.f32 %v1057_v55, %v1033_v31 }
 0x26e   : > { %v946_v3 = vadd.f32 %v938_v37, %v914_v30  ;;  %v1071_v43 = vadd.f32 %v1063_v0, %v1039_v48  ;;  %v1024_v19 = vmul.f32 %v2070_v62, %v2377_v61  ;;  %v1158_v62 = vld [vmem:[%s2338_s8] sm:$0xf]  ;;  %v2379_v59 = vmov 0.0  }
 0x26f   : > { %v945_v18 = vadd.f32 %v937_v27, %v913_v16  ;;  %v1070_v50 = vadd.f32 %v1062_v23, %v1038_v34  ;;  %v1067_v15 = vadd.f32 %v1059_v60, %v1035_v42  ;;  %1419 = vmatprep.mubr.msk.f32.mxu1 %vm1658_vm0, %v2379_v59  ;;  %v853_v23 = vmul.f32 %v845_v56, %v2162_v32 }
 0x270   : > { %1088 = vrot.lane.b32.xlu1 %v1068_v46, %s1657_s27  ;;  %v1032_v24 = vadd.f32 %v1024_v19, %v1000_v63  ;;  %v825_v7 = vpop.permute.xlu0 %824  ;;  %v854_v32 = vmul.f32 %v849_v4, %v2200_v44 }
 0x271   : > { %967 = vrot.lane.b32.xlu0 %v945_v18, %s1656_s14 }
 0x272   : > { %v1064_v9 = vadd.f32 %v1056_v13, %v1032_v24 }
 0x274   : > { %969 = vrot.lane.b32.xlu1 %v946_v3, %s1656_s14  ;;  %v813_v17 = vpop.permute.xlu0 %812  ;;  %v830_v3 = vmul.f32 %v825_v7, %v1901_v57 }
 0x275   : > { %1092 = vrot.lane.b32.xlu0 %v1070_v50, %s1657_s27 }
 0x277   : > { %v805_v38 = vpop.permute.xlu1 %804 }
 0x278   : > { %1094 = vrot.lane.b32.xlu1 %v1071_v43, %s1657_s27  ;;  %v810_v8 = vmul.f32 %v805_v38, %v2179_v54 }
 0x279   : > { %1115 = vperm.xlu0 %1539, %v1109_v39   ;;  %v1131_v47 = vpop.permute.xlu0 %1130 }
 0x27a   : > { %v834_v48 = vadd.f32 %v830_v3, %v810_v8 }
 0x27b   : > { %v800_v10 = vpop.permute.xlu1 %799 }
 0x27c   : > { %1086 = vrot.lane.b32.xlu1 %v1067_v15, %s1657_s27  ;;  %v809_v33 = vmul.f32 %v800_v10, %v2147_v28  ;;  %v858_v39 = vadd.f32 %v854_v32, %v834_v48  ;;  %v827_v10 = vmul.f32 %v813_v17, %v2377_v61 }
 0x27d   : > { %1082 = vrot.lane.b32.xlu0 %v1065_v36, %s1657_s27  ;;  %v1126_v29 = vpop.permute.xlu0 %1125 }
 0x280   : > { %1080 = vrot.lane.b32.xlu1 %v1064_v9, %s1657_s27  ;;  %v821_v2 = vpop.permute.xlu1 %820  ;;  %s2284_s27 = scalar_lea.hbm %s2339_s9, %s1401_s20 }
 0x281   : > { %v829_v27 = vmul.f32 %v821_v2, %v1891_v51 }
 0x283   : > { %v833_v20 = vadd.f32 %v829_v27, %v809_v33 }
 0x284   : > { %1161 = vperm.xlu1 %1540, %v1158_v62  }
 0x285   : > { %v795_v40 = vpop.permute.xlu1 %794  ;;  %v857_v0 = vadd.f32 %v853_v23, %v833_v20 }
 0x286   : > { %v808_v54 = vmul.f32 %v795_v40, %v2107_v35 }
 0x28a   : > { %v817_v41 = vpop.permute.xlu1 %816 }
 0x28b   : > { %v828_v21 = vmul.f32 %v817_v41, %v1881_v45 }
 0x28d   : > { %v832_v55 = vadd.f32 %v828_v21, %v808_v54 }
 0x28f   : > { %v790_v1 = vpop.permute.xlu1 %789 }
 0x290   : > { %v807_v35 = vmul.f32 %v790_v1, %v2378_v53 }
 0x292   : > { %v831_v4 = vadd.f32 %v827_v10, %v807_v35 }
 0x294   : > { %v841_v25 = vpop.permute.xlu1 %840 }
 0x295   : > { %v852_v49 = vmul.f32 %v841_v25, %v2114_v26 }
 0x297   : > { %v856_v44 = vadd.f32 %v852_v49, %v832_v55 }
 0x298   : > { %v837_v11 = vpop.permute.xlu1 %836 }
 0x299   : > { %v851_v2 = vmul.f32 %v837_v11, %v2127_v12 }
 0x29b   : > { %v855_v25 = vadd.f32 %v851_v2, %v831_v4 }
 0x29d   : > { %v1121_v22 = vpop.permute.xlu1 %1120 }
 0x2d2   : > { %v958_v52 = vpop.permute.xlu1 %957 }
 0x2d3   : > { %v956_v5 = vpop.permute.xlu0 %955 }
 0x2d4   : > { %v972_v7 = vsel %vm971_vm1, %v956_v5, %v958_v52 }
 0x2d6   : > { %v960_v58 = vpop.permute.xlu1 %959 }
 0x2d7   : > { %v962_v16 = vpop.permute.xlu0 %961 }
 0x2d8   : > { %v973_v63 = vsel %vm971_vm1, %v960_v58, %v962_v16 }
 0x2d9   : > { %v981_v36 = vadd.f32 %v973_v63, %v856_v44 }
 0x2da   : > { %v966_v37 = vpop.permute.xlu1 %965 }
 0x2db   : > { %v1085_v46 = vpop.permute.xlu0 %1084 }
 0x2de   : > { %v964_v18 = vpop.permute.xlu1 %963 }
 0x2df   : > { %v974_v30 = vsel %vm971_vm1, %v964_v18, %v966_v37  ;;  %v1091_v34 = vpop.permute.xlu0 %1090 }
 0x2e0   : > { %v982_v50 = vadd.f32 %v974_v30, %v857_v0  ;;  %v1157_v0 = vld [vmem:[%s2337_s7] sm:$0xf] }
 0x2e2   : > { %v1089_v51 = vpop.permute.xlu1 %1088 }
 0x2e3   : > { %v1099_v28 = vsel %vm1096_vm2, %v1089_v51, %v1091_v34  ;;  %v968_v14 = vpop.permute.xlu0 %967 }
 0x2e4   : > { %v1107_v6 = vadd.f32 %v1099_v28, %v982_v50 }
 0x2e6   : > { %v970_v60 = vpop.permute.xlu1 %969  ;;  %v1135_v57 = vadd.f32 %v1126_v29, %v1107_v6 }
 0x2e7   : > { %v975_v43 = vsel %vm971_vm1, %v968_v14, %v970_v60  ;;  %v1093_v19 = vpop.permute.xlu0 %1092 }
 0x2e8   : > { %v983_v42 = vadd.f32 %v975_v43, %v858_v39  ;;  %v1143_v15 = vmul.f32 0.70710677, %v1135_v57  ;;  %v1139_v37 = vmul.f32 0.5, %v1135_v57 }
 0x2ea   : > { %v1095_v31 = vpop.permute.xlu1 %1094  ;;  %1541 = verf.f32 %v1143_v15 }
 0x2eb   : > { %v1100_v13 = vsel %vm1096_vm2, %v1093_v19, %v1095_v31 }
 0x2ec   : > { %v1108_v45 = vadd.f32 %v1100_v13, %v983_v42 }
 0x2ee   : > { %v1136_v24 = vadd.f32 %v1131_v47, %v1108_v45  ;;  %v1087_v9 = vpop.permute.xlu1 %1086  ;;  %v980_v47 = vadd.f32 %v972_v7, %v855_v25 }
 0x2ef   : > { %v1098_v62 = vsel %vm1096_vm2, %v1085_v46, %v1087_v9 }
 0x2f0   : > { %v1144_v26 = vmul.f32 0.70710677, %v1136_v24  ;;  %v1106_v38 = vadd.f32 %v1098_v62, %v981_v36  ;;  %v1140_v12 = vmul.f32 0.5, %v1136_v24 }
 0x2f2   : > { %v1134_v40 = vadd.f32 %v1121_v22, %v1106_v38  ;;  %1543 = verf.f32 %v1144_v26  ;;  %v1081_v29 = vpop.permute.xlu1 %1080 }
 0x2f4   : > { %v1142_v41 = vmul.f32 0.70710677, %v1134_v40  ;;  %v1116_v56 = vpop.permute.xlu0 %1115  ;;  %v1138_v5 = vmul.f32 0.5, %v1134_v40 }
 0x2f6   : > { %1545 = verf.f32 %v1142_v41 }
 0x2f7   : > { %v1542_v27 = vpop.eup %1541 }
 0x2f8   : > { %v1083_v58 = vpop.permute.xlu0 %1082  ;;  %v1151_v22 = vadd.f32 1.0, %v1542_v27 }
 0x2f9   : > { %v1097_v53 = vsel %vm1096_vm2, %v1081_v29, %v1083_v58 }
 0x2fa   : > { %v1105_v1 = vadd.f32 %v1097_v53, %v980_v47  ;;  %v1155_v52 = vmul.f32 %v1151_v22, %v1139_v37 }
 0x2fc   : > { %v1133_v16 = vadd.f32 %v1116_v56, %v1105_v1 }
 0x2fe   : > { %v1141_v61 = vmul.f32 0.70710677, %v1133_v16  ;;  %v1137_v30 = vmul.f32 0.5, %v1133_v16 }
 0x2ff   : > { %v1544_v17 = vpop.eup %1543 }
 0x300   : > { %1547 = verf.f32 %v1141_v61  ;;  %v1152_v11 = vadd.f32 1.0, %v1544_v17 }
 0x302   : > { %v1156_v33 = vmul.f32 %v1152_v11, %v1140_v12 }
 0x303   : > { %v1546_v46 = vpop.eup %1545 }
 0x304   : > { %1412 = vmatpush3.msra.mxu1 %v1156_v33  ;;  %v1150_v20 = vadd.f32 1.0, %v1546_v46 }
 0x305   : > { %1413 = vmatprep.subr.mxu1 %v2379_v59 }
 0x306   : > { %1414 = vmatpush3.msra.mxu1 %v1155_v52  ;;  %v1154_v23 = vmul.f32 %v1150_v20, %v1138_v5 }
 0x307   : > { %1415 = vmatprep.subr.mxu1 %v2379_v59 }
 0x308   : > { %1416 = vmatpush3.msra.mxu1 %v1154_v23 }
 0x309   : > { %1417 = vmatprep.subr.mxu1 %v2379_v59  ;;  %v1162_v59 = vpop.permute.xlu1 %1161 }
 0x30d   : > { %v1548_v18 = vpop.eup %1547 }
 0x30e   : > { %v1149_v34 = vadd.f32 1.0, %v1548_v18 }
 0x310   : > { %v1153_v8 = vmul.f32 %v1149_v34, %v1137_v30 }
 0x312   : > { %1418 = vmatpush3.msra.mxu1 %v1153_v8 }
 0x313   : > { %1420 = vmatmul.mubr.msk.f32.vlgmr.msra.gmra.mxu1 %vm1164_vm3, %v1157_v0 }
 0x3d3   : > { %v1234_v3 = vpop.f32.mrf.mxu1 }
 0x3d4   : > { %v1235_v50 = vadd.f32 %v1234_v3, %v1162_v59 }
 0x3d5   : > { %v1421_v51 = vpop.f32.mrf.mxu1 }
 0x3d6   : > { %1238 = vst [vmem:[%s423_s24] sm:$0xf] %v1235_v50 }
 0x3d7   : > { %1562 = shalt.err (!%p1559_p12)
}
 0x3d8   : > { %s1563_s15 = scalar_lea.hbm %s2284_s27, 64  ;;  %s1567_s25 = scalar_lea.hbm %s2339_s9, 256 }
 0x3d9   : > { %p1564_p13 = scmp.ne.s32.totalorder %s2284_s27, %s1563_s15  ;;  %p1568_p2 = scmp.lt.s32.totalorder %s2284_s27, %s2339_s9 }
 0x3da   : > { %p1569_p4 = scmp.lt.s32.totalorder %s1567_s25, %s1563_s15 }
 0x3db   : > { %p1565_p0 = pnand %p1564_p13, %p1761_p3 }
 0x3dc   : > { %p1570_p5 = por %p1569_p4, %p1568_p2 }
 0x3dd   : > { %p1566_p1 = pneg %p1565_p0 }
 0x3df   : > { %p1571_p6 = pnand %p1570_p5, %p1566_p1 }
 0x3e1   : > { %1574 = shalt.err (!%p1571_p6)
}
 0x3e2   : > { %1422 = dma.vmem_to_hbm [thread:$0]  (%p1761_p3), %s1256_s19, 64, %s2284_s27, %s1240_s28  }
 0x3e3 PF: > { %p1428_p7 = scmp.ge.s32.totalorder %s1641_s16, 2  ;;  %s1267_s20 = sand.u32 1, %s1613_s30  }
 0x3e4   : > { %s1268_s24 = scalar_lea.sflag [#allocation3], %s1267_s20 }
 0x3e5   : > { %p1425_p9 = pnand %p1428_p7, %p1770_p8 }
 0x3e7   : > { %p1426_p10 = pneg %p1425_p9 }
 0x3e9   : > { %1608 = dma.done.wait (%p1426_p10), %s1268_s24, 64  }
 0x3ea   : > { %1610 = vsyncadd (%p1426_p10), %s1268_s24, 4294967232  ;;  %s22_s16 = sadd.s32 1, %s1641_s16   ;;  %s2381_s26 = sld [smem:[#allocation5_spill]] }
 0x3eb   : > { %p19_p11 = scmp.ge.s32.totalorder %s22_s16, 6   ;;  %s2382_s11 = sld [smem:[#allocation11_spill]] }
 0x3ec   : > { %s2383_s12 = sld [smem:[#allocation6_spill]]  ;;  %s2387_s30 = smov %s1617_s10 }
 0x3ed   : > { %s2384_s13 = sld [smem:[#allocation7_spill]]  ;;  %21 = sbr.rel (!%p19_p11) target bundleno = 7 (0x7), region = 97 }
 0x3ee   : > { %s2385_s14 = sld [smem:[#allocation8_spill]] }
 0x3ef   : > { %s2386_s15 = sld [smem:[#allocation9_spill]] }
 0x3f0   : > { %s2388_s10 = smov %s2381_s26 }
 0x3f2   :  { %1273 = vsyncpa [#allocation3], 1 }
 0x3f3   :  { %1275 = vsyncpa [#allocation3 + $0x1], 1 }

</bundles_post_ra>
